<compile_context>
chip_gen: v7x
topology: tpu7x:2x2x1
jax: 0.10.0
libtpu: 0.0.40
codegen_flags: <defaults>
</compile_context>

<pallas_src>
import functools

import jax
import jax.numpy as jnp
from jax.experimental import pallas as pl
from jax.experimental.pallas import tpu as pltpu


def _deriv_conv_kernel(f_ref, x_ref, o_ref, *, K):
    # f_ref: SMEM (K*K,) filter already scaled by 1/resol (row-major kh, kw)
    # x_ref: VMEM (NB, H, W)   block of images
    # o_ref: VMEM (NB, Ho, Wo) valid-conv output for that block
    _, Ho, Wo = o_ref.shape
    xv = x_ref[...].astype(jnp.float32)            # load once, keep in vregs
    acc = f_ref[0] * xv[:, :Ho, :Wo]
    for idx in range(1, K * K):                    # static unrolled stencil taps
        kh, kw = idx // K, idx % K
        acc = acc + f_ref[idx] * xv[:, kh:kh + Ho, kw:kw + Wo]
    o_ref[...] = acc.astype(o_ref.dtype)


def _pick_batch_block(N, H, W, itemsize, vmem_budget_bytes=8 << 20):
    """Largest divisor of N whose block fits comfortably in VMEM."""
    # per image: input (itemsize) + output (itemsize) + f32 accumulator,
    # times 2 for double buffering of the auto-pipeline.
    per_image = H * W * (2 * itemsize + 4) * 2
    nb = 1
    for cand in range(1, N + 1):
        if N % cand == 0 and cand * per_image <= vmem_budget_bytes:
            nb = cand
    return nb


@jax.jit
def conv2d_derivative_forward(x, der_filter, resol):
    """x: (N, 1, H, W); der_filter: (1, 1, K, K); returns (N, 1, Ho, Wo)."""
    N, C, H, W = x.shape
    assert C == 1, "Conv2dDerivative has a single input channel"
    K = der_filter.shape[-1]
    Ho, Wo = H - K + 1, W - K + 1

    # Fold the 1/resol scaling into the (tiny) filter and flatten for SMEM.
    f = (der_filter.reshape(K * K) / resol).astype(jnp.float32)
    xs = x.reshape(N, H, W)

    NB = _pick_batch_block(N, H, W, x.dtype.itemsize)
    kernel = functools.partial(_deriv_conv_kernel, K=K)

    out = pl.pallas_call(
        kernel,
        out_shape=jax.ShapeDtypeStruct((N, Ho, Wo), x.dtype),
        grid=(N // NB,),
        in_specs=[
            # whole (K*K,) filter as SMEM scalars
            pl.BlockSpec(memory_space=pltpu.MemorySpace.SMEM),
            # NB full images per grid step
            pl.BlockSpec((NB, H, W), lambda n: (n, 0, 0)),
        ],
        out_specs=pl.BlockSpec((NB, Ho, Wo), lambda n: (n, 0, 0)),
        compiler_params=pltpu.CompilerParams(
            dimension_semantics=("parallel",)),
    )(f, xs)

    return out.reshape(N, 1, Ho, Wo)


if __name__ == "__main__":
    # Conv2dDerivative(DerFilter=laplace_op, resol=dx**2, kernel_size=3)
    batch, H, W = 2, 16, 16
    kernel_size = 3
    dx = 1.0 / 64.0
    resol = dx ** 2

    # 5-point Laplacian derivative filter, (out_c, in_c, K, K) = (1, 1, 3, 3)
    lap = jnp.array([[[[0.0, 1.0, 0.0],
                       [1.0, -4.0, 1.0],
                       [0.0, 1.0, 0.0]]]], dtype=jnp.float32)

    key = jax.random.PRNGKey(0)
    x = jax.random.normal(key, (batch, 1, H, W), dtype=jnp.float32)

    out = conv2d_derivative_forward(x, lap, resol)
    out = jax.block_until_ready(out)

    # Reference: XLA VALID conv (cross-correlation, like nn.Conv2d) / resol.
    ref = jax.lax.conv_general_dilated(
        x, lap, (1, 1), "VALID",
        dimension_numbers=("NCHW", "OIHW", "NCHW")) / resol
    assert out.shape == ref.shape
    assert jnp.allclose(out, ref, atol=1e-4, rtol=1e-5)

    print("KERNEL_OK")
</pallas_src>

<mosaic_0001>
module attributes {stable_mosaic.version = 11 : i64} {
  func.func @_deriv_conv_kernel(%arg0: i32, %arg1: memref<9xf32, #tpu.memory_space<smem>>, %arg2: memref<2x16x16xf32, #tpu.memory_space<vmem>>, %arg3: memref<2x14x14xf32, #tpu.memory_space<vmem>>) attributes {dimension_semantics = [#tpu.dimension_semantics<parallel>], iteration_bounds = array<i64: 1>, scalar_prefetch = 0 : i64, scratch_operands = 0 : i64, tpu.core_type = #tpu.core_type<tc>, window_params = [{transform_indices = @transform_0, window_bounds = array<i64: 9>}, {transform_indices = @transform_1, window_bounds = array<i64: 2, 16, 16>}, {transform_indices = @transform_2, window_bounds = array<i64: 2, 14, 14>}]} {
    %c0 = arith.constant 0 : index
    %c0_0 = arith.constant 0 : index
    %c0_1 = arith.constant 0 : index
    %0 = vector.load %arg2[%c0, %c0_0, %c0_1] : memref<2x16x16xf32, #tpu.memory_space<vmem>>, vector<2x16x16xf32>
    %c0_2 = arith.constant 0 : index
    %1 = memref.load %arg1[%c0_2] : memref<9xf32, #tpu.memory_space<smem>>
    %2 = vector.extract_strided_slice %0 {offsets = [0, 0, 0], sizes = [2, 14, 14], strides = [1, 1, 1]} : vector<2x16x16xf32> to vector<2x14x14xf32>
    %3 = vector.broadcast %1 : f32 to vector<2x14x14xf32>
    %4 = arith.mulf %3, %2 : vector<2x14x14xf32>
    %c1 = arith.constant 1 : index
    %5 = memref.load %arg1[%c1] : memref<9xf32, #tpu.memory_space<smem>>
    %6 = vector.extract_strided_slice %0 {offsets = [0, 0, 1], sizes = [2, 14, 14], strides = [1, 1, 1]} : vector<2x16x16xf32> to vector<2x14x14xf32>
    %7 = vector.broadcast %5 : f32 to vector<2x14x14xf32>
    %8 = arith.mulf %7, %6 : vector<2x14x14xf32>
    %9 = arith.addf %4, %8 : vector<2x14x14xf32>
    %c2 = arith.constant 2 : index
    %10 = memref.load %arg1[%c2] : memref<9xf32, #tpu.memory_space<smem>>
    %11 = vector.extract_strided_slice %0 {offsets = [0, 0, 2], sizes = [2, 14, 14], strides = [1, 1, 1]} : vector<2x16x16xf32> to vector<2x14x14xf32>
    %12 = vector.broadcast %10 : f32 to vector<2x14x14xf32>
    %13 = arith.mulf %12, %11 : vector<2x14x14xf32>
    %14 = arith.addf %9, %13 : vector<2x14x14xf32>
    %c3 = arith.constant 3 : index
    %15 = memref.load %arg1[%c3] : memref<9xf32, #tpu.memory_space<smem>>
    %16 = vector.extract_strided_slice %0 {offsets = [0, 1, 0], sizes = [2, 14, 14], strides = [1, 1, 1]} : vector<2x16x16xf32> to vector<2x14x14xf32>
    %17 = vector.broadcast %15 : f32 to vector<2x14x14xf32>
    %18 = arith.mulf %17, %16 : vector<2x14x14xf32>
    %19 = arith.addf %14, %18 : vector<2x14x14xf32>
    %c4 = arith.constant 4 : index
    %20 = memref.load %arg1[%c4] : memref<9xf32, #tpu.memory_space<smem>>
    %21 = vector.extract_strided_slice %0 {offsets = [0, 1, 1], sizes = [2, 14, 14], strides = [1, 1, 1]} : vector<2x16x16xf32> to vector<2x14x14xf32>
    %22 = vector.broadcast %20 : f32 to vector<2x14x14xf32>
    %23 = arith.mulf %22, %21 : vector<2x14x14xf32>
    %24 = arith.addf %19, %23 : vector<2x14x14xf32>
    %c5 = arith.constant 5 : index
    %25 = memref.load %arg1[%c5] : memref<9xf32, #tpu.memory_space<smem>>
    %26 = vector.extract_strided_slice %0 {offsets = [0, 1, 2], sizes = [2, 14, 14], strides = [1, 1, 1]} : vector<2x16x16xf32> to vector<2x14x14xf32>
    %27 = vector.broadcast %25 : f32 to vector<2x14x14xf32>
    %28 = arith.mulf %27, %26 : vector<2x14x14xf32>
    %29 = arith.addf %24, %28 : vector<2x14x14xf32>
    %c6 = arith.constant 6 : index
    %30 = memref.load %arg1[%c6] : memref<9xf32, #tpu.memory_space<smem>>
    %31 = vector.extract_strided_slice %0 {offsets = [0, 2, 0], sizes = [2, 14, 14], strides = [1, 1, 1]} : vector<2x16x16xf32> to vector<2x14x14xf32>
    %32 = vector.broadcast %30 : f32 to vector<2x14x14xf32>
    %33 = arith.mulf %32, %31 : vector<2x14x14xf32>
    %34 = arith.addf %29, %33 : vector<2x14x14xf32>
    %c7 = arith.constant 7 : index
    %35 = memref.load %arg1[%c7] : memref<9xf32, #tpu.memory_space<smem>>
    %36 = vector.extract_strided_slice %0 {offsets = [0, 2, 1], sizes = [2, 14, 14], strides = [1, 1, 1]} : vector<2x16x16xf32> to vector<2x14x14xf32>
    %37 = vector.broadcast %35 : f32 to vector<2x14x14xf32>
    %38 = arith.mulf %37, %36 : vector<2x14x14xf32>
    %39 = arith.addf %34, %38 : vector<2x14x14xf32>
    %c8 = arith.constant 8 : index
    %40 = memref.load %arg1[%c8] : memref<9xf32, #tpu.memory_space<smem>>
    %41 = vector.extract_strided_slice %0 {offsets = [0, 2, 2], sizes = [2, 14, 14], strides = [1, 1, 1]} : vector<2x16x16xf32> to vector<2x14x14xf32>
    %42 = vector.broadcast %40 : f32 to vector<2x14x14xf32>
    %43 = arith.mulf %42, %41 : vector<2x14x14xf32>
    %44 = arith.addf %39, %43 : vector<2x14x14xf32>
    %c0_3 = arith.constant 0 : index
    %c0_4 = arith.constant 0 : index
    %c0_5 = arith.constant 0 : index
    %45 = vector.load %arg3[%c0_3, %c0_4, %c0_5] : memref<2x14x14xf32, #tpu.memory_space<vmem>>, vector<2x14x14xf32>
    tpu.vector_store %arg3[%c0_3, %c0_4, %c0_5], %44 {strides = array<i32>} : memref<2x14x14xf32, #tpu.memory_space<vmem>>, vector<2x14x14xf32>,
    return
  }
  func.func @transform_0(%arg0: i32) -> i32 {
    %c0_i32 = arith.constant 0 : i32
    %c0_i32_0 = arith.constant 0 : i32
    return %c0_i32 : i32
  }
  func.func @transform_1(%arg0: i32) -> (i32, i32, i32) {
    %c0_i32 = arith.constant 0 : i32
    %c0_i32_0 = arith.constant 0 : i32
    %c0_i32_1 = arith.constant 0 : i32
    return %arg0, %c0_i32, %c0_i32_0 : i32, i32, i32
  }
  func.func @transform_2(%arg0: i32) -> (i32, i32, i32) {
    %c0_i32 = arith.constant 0 : i32
    %c0_i32_0 = arith.constant 0 : i32
    %c0_i32_1 = arith.constant 0 : i32
    return %arg0, %c0_i32, %c0_i32_0 : i32, i32, i32
  }
}

</mosaic_0001>

<bundles_post_ra>
// kernel: conv2d_derivative_forward.1
= control target key start
LH: loop header
LB: loop body
LE: loop exit
PB: predicated region body
PF: predicated region fallthrough
CT: control target
= control target key end

     0   :  { %7 = vsyncpa [#allocation4], 0  ;;  %s507_s0 = inlined_call_operand.vmem [shape: f32[9], index: 0, kind: input, shape index: {}]   ;;  %s508_s1 = inlined_call_operand.hbm [shape: f32[2,16,16], index: 1, kind: input, shape index: {}]   ;;  %s509_s2 = inlined_call_operand.vmem [shape: f32[2,14,14], index: 2, kind: output, shape index: {}]  }
   0x1   :  { %s15_s11 = sshll.u32 %s507_s0, 4  ;;  %s16_s11 = int_to_ptr.vmem [resolvable:$true] %s15_s11 }
   0x2   :  { %8 = vsyncpa [#allocation3], 0  ;;  %s304_s12 = scalar_lea.vmem %s16_s11, 16  ;;  %p309_p1 = scmp.lt.s32.totalorder %s16_s11, %s16_s11 }
   0x3   :  { %p305_p0 = scmp.ne.s32.totalorder %s16_s11, %s304_s12  ;;  %p310_p2 = scmp.lt.s32.totalorder %s304_s12, %s304_s12 }
   0x5   :  { %p311_p3 = por %p310_p2, %p309_p1 }
   0x7   :  { %p312_p4 = pnand %p311_p3, %p305_p0 }
   0x9   :  { %315 = shalt.err (!%p312_p4)
}
   0xa   :  { %s342_s13 = smov [#allocation2]   ;;  %s343_s14 = smov [#allocation5]  }
   0xb   :  { %18 = dma.vmem_to_smem %s16_s11, 16, %s342_s13, [#allocation4]  }
   0xc   :  { %s24_s15 = sshll.u32 %s343_s14, 4  ;;  %s316_s18 = scalar_lea.hbm %s508_s1, 512  ;;  %s25_s15 = int_to_ptr.vmem [resolvable:$true] %s24_s15 }
   0xd   :  { %p317_p5 = scmp.ne.s32.totalorder %s508_s1, %s316_s18  ;;  %p320_p6 = scmp.lt.u32.totalorder %s316_s18, %s508_s1 }
   0xf   :  { %p322_p7 = pnand %p320_p6, %p317_p5 }
  0x11   :  { %325 = shalt.err (!%p322_p7)
}
  0x12   :  { %s326_s22 = scalar_lea.vmem %s25_s15, 512  ;;  %p331_p9 = scmp.lt.s32.totalorder %s25_s15, %s25_s15 }
  0x13   :  { %p327_p8 = scmp.ne.s32.totalorder %s25_s15, %s326_s22  ;;  %p332_p10 = scmp.lt.s32.totalorder %s326_s22, %s326_s22 }
  0x15   :  { %p333_p11 = por %p332_p10, %p331_p9 }
  0x17   :  { %p334_p12 = pnand %p333_p11, %p327_p8 }
  0x19   :  { %337 = shalt.err (!%p334_p12)
}
  0x1a   :  { %s344_s23 = smov 128   ;;  %s345_s24 = smov 8  }
  0x1b   :  { %30 = dma.hbm_to_vmem [thread:$0]  %s508_s1, 512, %s25_s15, [#allocation3], %s344_s23, %s344_s23, %s345_s24  }
  0x1c   :  { %338 = dma.done.wait [#allocation4], 16  }
  0x1d   :  { %339 = vsyncadd [#allocation4], 4294967280 }
  0x1e   :  { %340 = dma.done.wait [#allocation3], 512  }
  0x1f   :  { %341 = vsyncadd [#allocation3], 4294966784 }
  0x20   :  { %37 = sfence }
  0x21   :  { %s290_s27 = sld [smem:[#allocation2 + $0x1]]  ;;  %s291_s28 = sld [smem:[#allocation2 + $0x2]]  ;;  %v378_v0 = vld [vmem:[#allocation5 + $0x10] sm:$0xff]  ;;  %v380_v1 = vld [vmem:[#allocation5] sm:$0xff]  ;;  %v382_v3 = vld [vmem:[#allocation5 + $0x18] sm:$0xff]  ;;  %vm110_vm0 = vcmask 1046528  }
  0x22   :  { %s293_s29 = sld [smem:[#allocation2 + $0x4]]  ;;  %v384_v4 = vld [vmem:[#allocation5 + $0x8] sm:$0xff]  ;;  %s294_s30 = sld [smem:[#allocation2 + $0x5]]  ;;  %vm199_vm1 = vcmask 1045504   ;;  %vm280_vm2 = vcmask 111616   ;;  %vm278_vm3 = vcmask 113664  }
  0x23   :  { %s346_s1 = smov 127   ;;  %s292_s3 = sld [smem:[#allocation2 + $0x3]] }
  0x24   :  { %s295_s4 = sld [smem:[#allocation2 + $0x6]]  ;;  %s347_s5 = smov 126  }
  0x25   :  { %s405_s6 = sld [smem:[#allocation2 + $0x7]]  ;;  %s297_s7 = sld [smem:[#allocation2 + $0x8]] }
  0x26   :  { %s42_s8 = sld [smem:[#allocation2]] }
  0x27   :  { %v49_v2 = vstv %s290_s27  ;;  %v75_v9 = vstv %s291_s28 }
  0x28   :  { %v52_v5 = vmul.f32 %v49_v2, %v378_v0  ;;  %v50_v6 = vmul.f32 %v49_v2, %v380_v1  ;;  %v53_v7 = vmul.f32 %v49_v2, %v382_v3  ;;  %v51_v8 = vmul.f32 %v49_v2, %v384_v4 }
  0x29   :  { %v126_v10 = vstv %s293_s29  ;;  %v77_v11 = vmul.f32 %v75_v9, %v384_v4  ;;  %v76_v12 = vmul.f32 %v75_v9, %v380_v1  ;;  %v158_v15 = vstv %s294_s30 }
  0x2a   :  { %62 = vrot.lane.b32.xlu1 %v52_v5, %s346_s1  ;;  %58 = vrot.lane.b32.xlu0 %v50_v6, %s346_s1  ;;  %v128_v13 = vmul.f32 %v126_v10, %v384_v4  ;;  %v127_v14 = vmul.f32 %v126_v10, %v380_v1  ;;  %v79_v16 = vmul.f32 %v75_v9, %v382_v3  ;;  %v101_v29 = vstv %s292_s3 }
  0x2b   :  { %v130_v17 = vmul.f32 %v126_v10, %v382_v3  ;;  %v78_v18 = vmul.f32 %v75_v9, %v378_v0  ;;  %v129_v19 = vmul.f32 %v126_v10, %v378_v0  ;;  %v160_v20 = vmul.f32 %v158_v15, %v384_v4 }
  0x2c   :  { %v136_v21 = vrot.slane %v128_v13, 1  ;;  %v135_v22 = vrot.slane %v127_v14, 1  ;;  %v159_v24 = vmul.f32 %v158_v15, %v380_v1  ;;  %v162_v25 = vmul.f32 %v158_v15, %v382_v3 }
  0x2d   :  { %v139_v23 = vrot.slane %v130_v17, 1  ;;  %v161_v26 = vmul.f32 %v158_v15, %v378_v0  ;;  %v138_v27 = vrot.slane %v129_v19, 1  ;;  %v168_v28 = vrot.slane %v160_v20, 1 }
  0x2e   :  { %64 = vrot.lane.b32.xlu1 %v53_v7, %s346_s1  ;;  %60 = vrot.lane.b32.xlu0 %v51_v8, %s346_s1  ;;  %v190_v30 = vstv %s295_s4  ;;  %v137_v31 = vsel %vm110_vm0, %v135_v22, %v136_v21  ;;  %v414_v32 = vmul.f32 %v101_v29, %v384_v4  ;;  %v102_v33 = vmul.f32 %v101_v29, %v380_v1 }
  0x2f   :  { %v418_v34 = vmul.f32 %v101_v29, %v382_v3  ;;  %v104_v35 = vmul.f32 %v101_v29, %v378_v0  ;;  %v422_v36 = vmul.f32 %v190_v30, %v384_v4  ;;  %v191_v37 = vmul.f32 %v190_v30, %v380_v1 }
  0x30   :  { %v426_v38 = vmul.f32 %v190_v30, %v382_v3  ;;  %v112_v39 = vrot.slane %v414_v32, 1  ;;  %v111_v40 = vrot.slane %v102_v33, 1  ;;  %v193_v42 = vmul.f32 %v190_v30, %v378_v0 }
  0x31   :  { %v115_v41 = vrot.slane %v418_v34, 1  ;;  %v114_v43 = vrot.slane %v104_v35, 1  ;;  %v201_v44 = vrot.slane %v422_v36, 2  ;;  %v200_v45 = vrot.slane %v191_v37, 2 }
  0x32   :  { %86 = vrot.lane.b32.xlu1 %v77_v11, %s347_s5  ;;  %84 = vrot.lane.b32.xlu0 %v76_v12, %s347_s5  ;;  %v204_v46 = vrot.slane %v426_v38, 2  ;;  %v140_v47 = vsel %vm110_vm0, %v138_v27, %v139_v23  ;;  %v167_v48 = vrot.slane %v159_v24, 1  ;;  %v113_v49 = vsel %vm110_vm0, %v111_v40, %v112_v39 }
  0x33   :  { %v203_v50 = vrot.slane %v193_v42, 2  ;;  %v215_v51 = vstv %s405_s6  ;;  %v116_v52 = vsel %vm110_vm0, %v114_v43, %v115_v41  ;;  %v446_v53 = vsel %vm199_vm1, %v200_v45, %v201_v44 }
  0x34   :  { %v171_v55 = vrot.slane %v162_v25, 1  ;;  %v169_v56 = vsel %vm110_vm0, %v167_v48, %v168_v28  ;;  %v170_v57 = vrot.slane %v161_v26, 1  ;;  %v217_v58 = vmul.f32 %v215_v51, %v384_v4 }
  0x35   :  { %v451_v54 = vsel %vm199_vm1, %v203_v50, %v204_v46  ;;  %v216_v59 = vmul.f32 %v215_v51, %v380_v1  ;;  %v219_v60 = vmul.f32 %v215_v51, %v382_v3  ;;  %v218_v2 = vmul.f32 %v215_v51, %v378_v0 }
  0x36   :  { %90 = vrot.lane.b32.xlu1 %v79_v16, %s347_s5  ;;  %88 = vrot.lane.b32.xlu0 %v78_v18, %s347_s5  ;;  %v172_v61 = vsel %vm110_vm0, %v170_v57, %v171_v55  ;;  %v225_v62 = vrot.slane %v217_v58, 2  ;;  %v247_v5 = vstv %s297_s7  ;;  %v43_v20 = vstv %s42_s8 }
  0x37   :  { %v224_v63 = vrot.slane %v216_v59, 2  ;;  %v228_v6 = vrot.slane %v219_v60, 2  ;;  %v227_v8 = vrot.slane %v218_v2, 2  ;;  %v249_v9 = vmul.f32 %v247_v5, %v384_v4 }
  0x38   :  { %v248_v10 = vmul.f32 %v247_v5, %v380_v1  ;;  %v251_v11 = vmul.f32 %v247_v5, %v382_v3  ;;  %v250_v15 = vmul.f32 %v247_v5, %v378_v0  ;;  %v46_v26 = vmul.f32 %v43_v20, %v378_v0 }
  0x39   :  { %v226_v7 = vsel %vm199_vm1, %v224_v63, %v225_v62  ;;  %v229_v12 = vsel %vm199_vm1, %v227_v8, %v228_v6  ;;  %v257_v13 = vrot.slane %v249_v9, 2  ;;  %v47_v50 = vmul.f32 %v43_v20, %v382_v3 }
  0x3a   :  { %143 = vrot.lane.b32.xlu1 %v136_v21, %s346_s1  ;;  %141 = vrot.lane.b32.xlu0 %v137_v31, %s346_s1  ;;  %v256_v14 = vrot.slane %v248_v10, 2  ;;  %v260_v17 = vrot.slane %v251_v11, 2  ;;  %v259_v18 = vrot.slane %v250_v15, 2 }
  0x3c   :  { %v258_v16 = vsel %vm199_vm1, %v256_v14, %v257_v13  ;;  %v261_v19 = vsel %vm199_vm1, %v259_v18, %v260_v17 }
  0x3e   :  { %147 = vrot.lane.b32.xlu1 %v139_v23, %s346_s1  ;;  %145 = vrot.lane.b32.xlu0 %v140_v47, %s346_s1  ;;  %v44_v23 = vmul.f32 %v43_v20, %v380_v1  ;;  %v45_v47 = vmul.f32 %v43_v20, %v384_v4 }
  0x42   :  { %175 = vrot.lane.b32.xlu1 %v168_v28, %s347_s5  ;;  %173 = vrot.lane.b32.xlu0 %v169_v56, %s347_s5 }
  0x46   :  { %179 = vrot.lane.b32.xlu1 %v171_v55, %s347_s5  ;;  %177 = vrot.lane.b32.xlu0 %v172_v61, %s347_s5 }
  0x4a   :  { %232 = vrot.lane.b32.xlu1 %v225_v62, %s346_s1  ;;  %230 = vrot.lane.b32.xlu0 %v226_v7, %s346_s1 }
  0x4e   :  { %236 = vrot.lane.b32.xlu1 %v228_v6, %s346_s1  ;;  %234 = vrot.lane.b32.xlu0 %v229_v12, %s346_s1 }
  0x52   :  { %264 = vrot.lane.b32.xlu1 %v257_v13, %s347_s5  ;;  %262 = vrot.lane.b32.xlu0 %v258_v16, %s347_s5 }
  0x56   :  { %268 = vrot.lane.b32.xlu1 %v260_v17, %s347_s5  ;;  %266 = vrot.lane.b32.xlu0 %v261_v19, %s347_s5 }
  0x9c   :  { %v63_v21 = vpop.permute.xlu1 %62  ;;  %v59_v22 = vpop.permute.xlu0 %58 }
  0x9d   :  { %v70_v27 = vadd.f32 %v59_v22, %v44_v23  ;;  %v72_v31 = vadd.f32 %v63_v21, %v46_v26 }
  0xa0   :  { %v65_v24 = vpop.permute.xlu1 %64  ;;  %v61_v25 = vpop.permute.xlu0 %60 }
  0xa1   :  { %v71_v51 = vadd.f32 %v61_v25, %v45_v47  ;;  %v73_v59 = vadd.f32 %v65_v24, %v47_v50 }
  0xa4   :  { %v87_v28 = vpop.permute.xlu1 %86  ;;  %v85_v29 = vpop.permute.xlu0 %84 }
  0xa5   :  { %v96_v30 = vadd.f32 %v85_v29, %v70_v27  ;;  %v97_v57 = vadd.f32 %v87_v28, %v71_v51 }
  0xa7   :  { %v121_v33 = vadd.f32 %v113_v49, %v96_v30  ;;  %v122_v4 = vadd.f32 %v112_v39, %v97_v57 }
  0xa8   :  { %v91_v35 = vpop.permute.xlu1 %90  ;;  %v89_v37 = vpop.permute.xlu0 %88 }
  0xa9   :  { %v98_v40 = vadd.f32 %v89_v37, %v72_v31  ;;  %v99_v62 = vadd.f32 %v91_v35, %v73_v59 }
  0xab   :  { %v123_v42 = vadd.f32 %v116_v52, %v98_v40  ;;  %v124_v7 = vadd.f32 %v115_v41, %v99_v62 }
  0xac   :  { %v144_v43 = vpop.permute.xlu1 %143  ;;  %v142_v45 = vpop.permute.xlu0 %141 }
  0xad   :  { %v153_v0 = vadd.f32 %v142_v45, %v121_v33  ;;  %v154_v2 = vadd.f32 %v144_v43, %v122_v4 }
  0xb0   :  { %v148_v48 = vpop.permute.xlu1 %147  ;;  %v146_v1 = vpop.permute.xlu0 %145 }
  0xb1   :  { %v155_v49 = vadd.f32 %v146_v1, %v123_v42  ;;  %v156_v9 = vadd.f32 %v148_v48, %v124_v7 }
  0xb4   :  { %v176_v55 = vpop.permute.xlu1 %175  ;;  %v174_v56 = vpop.permute.xlu0 %173 }
  0xb5   :  { %v185_v58 = vadd.f32 %v174_v56, %v153_v0  ;;  %v186_v8 = vadd.f32 %v176_v55, %v154_v2 }
  0xb7   :  { %v210_v60 = vadd.f32 %v446_v53, %v185_v58  ;;  %v211_v12 = vadd.f32 %v201_v44, %v186_v8 }
  0xb8   :  { %v180_v61 = vpop.permute.xlu1 %179  ;;  %v178_v52 = vpop.permute.xlu0 %177 }
  0xb9   :  { %v187_v63 = vadd.f32 %v178_v52, %v155_v49  ;;  %v188_v53 = vadd.f32 %v180_v61, %v156_v9 }
  0xbb   :  { %v212_v3 = vadd.f32 %v451_v54, %v187_v63  ;;  %v213_v54 = vadd.f32 %v204_v46, %v188_v53 }
  0xbc   :  { %v233_v5 = vpop.permute.xlu1 %232  ;;  %v231_v6 = vpop.permute.xlu0 %230 }
  0xbd   :  { %v243_v13 = vadd.f32 %v233_v5, %v211_v12  ;;  %v242_v32 = vadd.f32 %v231_v6, %v210_v60 }
  0xc0   :  { %v237_v10 = vpop.permute.xlu1 %236  ;;  %v235_v11 = vpop.permute.xlu0 %234 }
  0xc1   :  { %v245_v41 = vadd.f32 %v237_v10, %v213_v54  ;;  %v244_v16 = vadd.f32 %v235_v11, %v212_v3 }
  0xc4   :  { %v265_v39 = vpop.permute.xlu1 %264  ;;  %v263_v14 = vpop.permute.xlu0 %262 }
  0xc5   :  { %v275_v15 = vadd.f32 %v265_v39, %v243_v13  ;;  %v274_v34 = vadd.f32 %v263_v14, %v242_v32 }
  0xc7   :  { %281 = vst.msk [vmem:[%s509_s2 + $0x8] sm:$0x3f] %vm280_vm2, %v275_v15 }
  0xc8   :  { %279 = vst.msk [vmem:[%s509_s2] sm:$0xff] %vm278_vm3, %v274_v34  ;;  %v269_v36 = vpop.permute.xlu1 %268  ;;  %v267_v44 = vpop.permute.xlu0 %266 }
  0xc9   :  { %v277_v17 = vadd.f32 %v269_v36, %v245_v41  ;;  %v276_v18 = vadd.f32 %v267_v44, %v244_v16 }
  0xcb   :  { %283 = vst.msk [vmem:[%s509_s2 + $0x18] sm:$0x3f] %vm280_vm2, %v277_v17 }
  0xcc   :  { %282 = vst.msk [vmem:[%s509_s2 + $0x10] sm:$0xff] %vm278_vm3, %v276_v18 }
  0xcd   :  { %288 = vsyncpa [#allocation3], 1 }
  0xce   :  { %289 = vsyncpa [#allocation4], 1 }

</bundles_post_ra>
